<compile_context>
chip_gen: v7x
topology: tpu7x:2x2x1
jax: 0.10.0
libtpu: 0.0.40
codegen_flags: <defaults>
</compile_context>

<pallas_src>
import jax
import jax.numpy as jnp
from jax.experimental import pallas as pl
from jax.experimental.pallas import tpu as pltpu

NUM_VIEWS = 4
NUM_OBJECTS = 1
HIDDEN = 128
OUT_SIZE = NUM_OBJECTS * NUM_VIEWS * (6 + 1)   # 28
PAD_OUT = 128                                  # lane-dense output slab width
BN_EPS = 1e-5
BIAS_ROW = 64                                  # zero lane of xb carrying the l3 bias

# Lane offsets inside the single packed bf16 weight buffer [128, 1408]
_OFF_WA = 0      # [w01  | w02a]  (LHS: x0)   256 lanes
_OFF_WB = 256    # [w02b | w03a]  (LHS: x1)   256 lanes
_OFF_WC = 512    # [w03b | w04a]  (LHS: x2)   256 lanes
_OFF_WD = 768    # [w04b | w1a ]  (LHS: x3)   256 lanes
_OFF_W1B = 1024  # w1b            (LHS: x4)   128 lanes
_OFF_W2 = 1152   # w2 padded to [128,128]     128 lanes
_OFF_W3 = 1280   # w3 padded to [128,128], row BIAS_ROW = b3
_PACK_LANES = 1408


def _bn_relu(h):
    # BatchNorm1d (training mode, biased var, gamma=1, beta=0) + ReLU.
    # Single-pass variance: E[h^2] - mean^2 (safe at these magnitudes).
    mean = jnp.mean(h, axis=0, keepdims=True)
    var = jnp.mean(h * h, axis=0, keepdims=True) - mean * mean
    return jnp.maximum((h - mean) * jax.lax.rsqrt(var + BN_EPS), 0.0)


def _pose_kernel(x0_ref, w_ref, out_ref):
    def w(off, n):
        # static, lane-aligned slice of the packed weight buffer
        return w_ref[:, off:off + n]

    def mm(x_b16, w_slab):
        # bf16 x bf16 on the MXU, f32 accumulation
        return jnp.dot(x_b16, w_slab, preferred_element_type=jnp.float32)

    x0b = x0_ref[...].astype(jnp.bfloat16)

    hA = mm(x0b, w(_OFF_WA, 256))                 # [x1_pre | x0->x2 contrib]
    x1 = _bn_relu(hA[:, :HIDDEN])
    x1b = x1.astype(jnp.bfloat16)

    hB = mm(x1b, w(_OFF_WB, 256))                 # [x1->x2 | x1->x3]
    x2 = _bn_relu(hA[:, HIDDEN:] + hB[:, :HIDDEN])
    x2b = x2.astype(jnp.bfloat16)

    hC = mm(x2b, w(_OFF_WC, 256))                 # [x2->x3 | x2->x4]
    x3 = _bn_relu(hB[:, HIDDEN:] + hC[:, :HIDDEN])
    x3b = x3.astype(jnp.bfloat16)

    hD = mm(x3b, w(_OFF_WD, 256))                 # [x3->x4 | x3->xa]
    x4 = _bn_relu(hC[:, HIDDEN:] + hD[:, :HIDDEN])
    x4b = x4.astype(jnp.bfloat16)

    xa = _bn_relu(hD[:, HIDDEN:] + mm(x4b, w(_OFF_W1B, HIDDEN)))
    xb = _bn_relu(mm(xa.astype(jnp.bfloat16), w(_OFF_W2, HIDDEN)))  # lanes>=64 are 0

    lane = jax.lax.broadcasted_iota(jnp.int32, xb.shape, 1)
    # Set the (exactly-zero) BIAS_ROW lane to 1 so row BIAS_ROW of padded w3
    # injects the l3 bias through the matmul.
    xb = jnp.where(lane == BIAS_ROW, 1.0, xb)
    y = mm(xb.astype(jnp.bfloat16), w(_OFF_W3, HIDDEN))   # [B,128], bias included

    # Per-object softmax over the view-confidence lanes, via lane masks over
    # the full 128-lane row (no sub-128 slices).  exp is guarded so lanes
    # outside the segment never see huge arguments.
    out = y
    for o in range(NUM_OBJECTS):
        seg = (lane >= o * NUM_VIEWS) & (lane < (o + 1) * NUM_VIEWS)
        m = jnp.max(jnp.where(seg, y, -jnp.inf), axis=1, keepdims=True)
        e = jnp.where(seg, jnp.exp(jnp.where(seg, y, m) - m), 0.0)
        s = jnp.sum(e, axis=1, keepdims=True)
        out = jnp.where(seg, e * pl.reciprocal(s, approx=True), out)

    out_ref[...] = out                            # full-width, unmasked store


def prepare_params(params):
    """Split concat-weights, hstack shared-LHS pairs, zero-pad l2/l3 to 128
    lanes, fold b3 into row BIAS_ROW of padded w3, drop BN-cancelled biases,
    and pack everything into ONE contiguous bf16 buffer [128, 1408]."""
    (w01, _b01), (w02, _b02), (w03, _b03), (w04, _b04), \
        (w1, _b1), (w2, _b2), (w3, b3) = params

    w02a, w02b = w02[:HIDDEN], w02[HIDDEN:]
    w03a, w03b = w03[:HIDDEN], w03[HIDDEN:]
    w04a, w04b = w04[:HIDDEN], w04[HIDDEN:]
    w1a, w1b = w1[:HIDDEN], w1[HIDDEN:]

    w2p = jnp.zeros((HIDDEN, HIDDEN), jnp.float32).at[:, :w2.shape[1]].set(w2)
    w3p = jnp.zeros((HIDDEN, PAD_OUT), jnp.float32)
    w3p = w3p.at[:w3.shape[0], :OUT_SIZE].set(w3)
    w3p = w3p.at[BIAS_ROW, :OUT_SIZE].set(b3[0])

    packed = jnp.concatenate([
        jnp.concatenate([w01, w02a], axis=1),     # _OFF_WA
        jnp.concatenate([w02b, w03a], axis=1),    # _OFF_WB
        jnp.concatenate([w03b, w04a], axis=1),    # _OFF_WC
        jnp.concatenate([w04b, w1a], axis=1),     # _OFF_WD
        w1b,                                      # _OFF_W1B
        w2p,                                      # _OFF_W2
        w3p,                                      # _OFF_W3
    ], axis=1).astype(jnp.bfloat16)
    assert packed.shape == (HIDDEN, _PACK_LANES)
    return packed


@jax.jit
def pose_forward(x0, packed_w):
    b = x0.shape[0]
    vmem = pl.BlockSpec(memory_space=pltpu.MemorySpace.VMEM)
    out = pl.pallas_call(
        _pose_kernel,
        out_shape=jax.ShapeDtypeStruct((b, PAD_OUT), jnp.float32),
        in_specs=[vmem, vmem],
        out_specs=vmem,
    )(x0, packed_w)
    return out[:, :OUT_SIZE]


def init_params(key):
    # Deterministic, PyTorch-default-like init: U(-1/sqrt(fan_in), 1/sqrt(fan_in)).
    # Weights stored pre-transposed as [in, out]; biases as [1, out] (f32).
    dims = [
        (HIDDEN, HIDDEN),            # l01
        (2 * HIDDEN, HIDDEN),        # l02
        (2 * HIDDEN, HIDDEN),        # l03
        (2 * HIDDEN, HIDDEN),        # l04
        (2 * HIDDEN, HIDDEN),        # l1
        (HIDDEN, 64),                # l2
        (64, OUT_SIZE),              # l3
    ]
    params = []
    for i, (fan_in, fan_out) in enumerate(dims):
        kw, kb = jax.random.split(jax.random.fold_in(key, i))
        bound = 1.0 / (fan_in ** 0.5)
        w = jax.random.uniform(kw, (fan_in, fan_out), jnp.float32, -bound, bound)
        bias = jax.random.uniform(kb, (1, fan_out), jnp.float32, -bound, bound)
        params.append((w, bias))
    return params


def reference_forward(x0, params):
    # Pure-JAX reference mirroring the PyTorch forward (training-mode BN),
    # with the same bf16-weight / bf16-matmul-input, f32-accumulate policy as
    # the kernel.  All biases are included (the kernel drops the
    # BN-cancelled ones, which is mathematically equivalent).
    def lin(x, p):
        w, b = p
        return jnp.dot(x.astype(jnp.bfloat16), w.astype(jnp.bfloat16),
                       preferred_element_type=jnp.float32) + b

    def bn_relu(h):
        mean = jnp.mean(h, axis=0, keepdims=True)
        var = jnp.mean((h - mean) * (h - mean), axis=0, keepdims=True)
        return jnp.maximum((h - mean) * jax.lax.rsqrt(var + BN_EPS), 0.0)

    x1 = bn_relu(lin(x0, params[0]))
    x2 = bn_relu(lin(jnp.concatenate([x0, x1], axis=1), params[1]))
    x3 = bn_relu(lin(jnp.concatenate([x1, x2], axis=1), params[2]))
    x4 = bn_relu(lin(jnp.concatenate([x2, x3], axis=1), params[3]))
    xx = bn_relu(lin(jnp.concatenate([x3, x4], axis=1), params[4]))
    xx = bn_relu(lin(xx, params[5]))
    y = lin(xx, params[6])
    confs = jax.nn.softmax(
        y[:, :NUM_OBJECTS * NUM_VIEWS].reshape(-1, NUM_OBJECTS, NUM_VIEWS),
        axis=2).reshape(-1, NUM_OBJECTS * NUM_VIEWS)
    return jnp.concatenate([confs, y[:, NUM_OBJECTS * NUM_VIEWS:]], axis=1)


if __name__ == "__main__":
    key = jax.random.PRNGKey(0)
    kx, kp = jax.random.split(key)
    B = 8
    x0 = jax.random.normal(kx, (B, HIDDEN), jnp.float32)   # model_in: [B, 128]
    params = init_params(kp)
    packed_w = prepare_params(params)                       # one-time weight prep

    out = pose_forward(x0, packed_w)
    out = jax.block_until_ready(out)

    ref = reference_forward(x0, params)
    assert out.shape == (B, OUT_SIZE)
    assert bool(jnp.all(jnp.isfinite(out)))
    assert jnp.allclose(out, ref, atol=3e-3, rtol=3e-3), "mismatch vs JAX reference"
    print("KERNEL_OK")
</pallas_src>

<mosaic_0001>
module attributes {stable_mosaic.version = 11 : i64} {
  func.func @_pose_kernel(%arg0: memref<8x128xf32, #tpu.memory_space<vmem>>, %arg1: memref<128x1408xbf16, #tpu.memory_space<vmem>>, %arg2: memref<8x128xf32, #tpu.memory_space<vmem>>) attributes {dimension_semantics = [], scalar_prefetch = 0 : i64, scratch_operands = 0 : i64, tpu.core_type = #tpu.core_type<tc>} {
    %c0 = arith.constant 0 : index
    %c0_0 = arith.constant 0 : index
    %0 = vector.load %arg0[%c0, %c0_0] : memref<8x128xf32, #tpu.memory_space<vmem>>, vector<8x128xf32>
    %1 = arith.truncf %0 : vector<8x128xf32> to vector<8x128xbf16>
    %c0_1 = arith.constant 0 : index
    %c0_2 = arith.constant 0 : index
    %2 = vector.load %arg1[%c0_1, %c0_2] : memref<128x1408xbf16, #tpu.memory_space<vmem>>, vector<128x256xbf16>
    %cst = arith.constant dense<0.000000e+00> : vector<8x256xf32>
    %3 = tpu.matmul %1, %2, %cst {dimension_numbers = #tpu.dot_dimension_numbers<[1], [0], [0], [1], [0, 0, 1, 1], [], []>} : vector<8x128xbf16>, vector<128x256xbf16>, vector<8x256xf32> -> vector<8x256xf32>
    %4 = vector.extract_strided_slice %3 {offsets = [0, 0], sizes = [8, 128], strides = [1, 1]} : vector<8x256xf32> to vector<8x128xf32>
    %cst_3 = arith.constant dense<0.000000e+00> : vector<128xf32>
    %5 = vector.multi_reduction <add>, %4, %cst_3 [0] : vector<8x128xf32> to vector<128xf32>
    %6 = vector.shape_cast %5 : vector<128xf32> to vector<1x128xf32>
    %cst_4 = arith.constant 8.000000e+00 : f32
    %7 = vector.broadcast %cst_4 : f32 to vector<1x128xf32>
    %8 = arith.divf %6, %7 : vector<1x128xf32>
    %9 = arith.mulf %4, %4 : vector<8x128xf32>
    %cst_5 = arith.constant dense<0.000000e+00> : vector<128xf32>
    %10 = vector.multi_reduction <add>, %9, %cst_5 [0] : vector<8x128xf32> to vector<128xf32>
    %11 = vector.shape_cast %10 : vector<128xf32> to vector<1x128xf32>
    %cst_6 = arith.constant 8.000000e+00 : f32
    %12 = vector.broadcast %cst_6 : f32 to vector<1x128xf32>
    %13 = arith.divf %11, %12 : vector<1x128xf32>
    %14 = arith.mulf %8, %8 : vector<1x128xf32>
    %15 = arith.subf %13, %14 : vector<1x128xf32>
    %16 = vector.broadcast %8 : vector<1x128xf32> to vector<8x128xf32>
    %17 = arith.subf %4, %16 : vector<8x128xf32>
    %cst_7 = arith.constant 9.99999974E-6 : f32
    %18 = vector.broadcast %cst_7 : f32 to vector<1x128xf32>
    %19 = arith.addf %15, %18 : vector<1x128xf32>
    %20 = math.rsqrt %19 : vector<1x128xf32>
    %21 = vector.broadcast %20 : vector<1x128xf32> to vector<8x128xf32>
    %22 = arith.mulf %17, %21 : vector<8x128xf32>
    %cst_8 = arith.constant 0.000000e+00 : f32
    %23 = vector.broadcast %cst_8 : f32 to vector<8x128xf32>
    %24 = arith.maximumf %22, %23 : vector<8x128xf32>
    %25 = arith.truncf %24 : vector<8x128xf32> to vector<8x128xbf16>
    %c0_9 = arith.constant 0 : index
    %c256 = arith.constant 256 : index
    %26 = vector.load %arg1[%c0_9, %c256] : memref<128x1408xbf16, #tpu.memory_space<vmem>>, vector<128x256xbf16>
    %cst_10 = arith.constant dense<0.000000e+00> : vector<8x256xf32>
    %27 = tpu.matmul %25, %26, %cst_10 {dimension_numbers = #tpu.dot_dimension_numbers<[1], [0], [0], [1], [0, 0, 1, 1], [], []>} : vector<8x128xbf16>, vector<128x256xbf16>, vector<8x256xf32> -> vector<8x256xf32>
    %28 = vector.extract_strided_slice %3 {offsets = [0, 128], sizes = [8, 128], strides = [1, 1]} : vector<8x256xf32> to vector<8x128xf32>
    %29 = vector.extract_strided_slice %27 {offsets = [0, 0], sizes = [8, 128], strides = [1, 1]} : vector<8x256xf32> to vector<8x128xf32>
    %30 = arith.addf %28, %29 : vector<8x128xf32>
    %cst_11 = arith.constant dense<0.000000e+00> : vector<128xf32>
    %31 = vector.multi_reduction <add>, %30, %cst_11 [0] : vector<8x128xf32> to vector<128xf32>
    %32 = vector.shape_cast %31 : vector<128xf32> to vector<1x128xf32>
    %cst_12 = arith.constant 8.000000e+00 : f32
    %33 = vector.broadcast %cst_12 : f32 to vector<1x128xf32>
    %34 = arith.divf %32, %33 : vector<1x128xf32>
    %35 = arith.mulf %30, %30 : vector<8x128xf32>
    %cst_13 = arith.constant dense<0.000000e+00> : vector<128xf32>
    %36 = vector.multi_reduction <add>, %35, %cst_13 [0] : vector<8x128xf32> to vector<128xf32>
    %37 = vector.shape_cast %36 : vector<128xf32> to vector<1x128xf32>
    %cst_14 = arith.constant 8.000000e+00 : f32
    %38 = vector.broadcast %cst_14 : f32 to vector<1x128xf32>
    %39 = arith.divf %37, %38 : vector<1x128xf32>
    %40 = arith.mulf %34, %34 : vector<1x128xf32>
    %41 = arith.subf %39, %40 : vector<1x128xf32>
    %42 = vector.broadcast %34 : vector<1x128xf32> to vector<8x128xf32>
    %43 = arith.subf %30, %42 : vector<8x128xf32>
    %cst_15 = arith.constant 9.99999974E-6 : f32
    %44 = vector.broadcast %cst_15 : f32 to vector<1x128xf32>
    %45 = arith.addf %41, %44 : vector<1x128xf32>
    %46 = math.rsqrt %45 : vector<1x128xf32>
    %47 = vector.broadcast %46 : vector<1x128xf32> to vector<8x128xf32>
    %48 = arith.mulf %43, %47 : vector<8x128xf32>
    %cst_16 = arith.constant 0.000000e+00 : f32
    %49 = vector.broadcast %cst_16 : f32 to vector<8x128xf32>
    %50 = arith.maximumf %48, %49 : vector<8x128xf32>
    %51 = arith.truncf %50 : vector<8x128xf32> to vector<8x128xbf16>
    %c0_17 = arith.constant 0 : index
    %c512 = arith.constant 512 : index
    %52 = vector.load %arg1[%c0_17, %c512] : memref<128x1408xbf16, #tpu.memory_space<vmem>>, vector<128x256xbf16>
    %cst_18 = arith.constant dense<0.000000e+00> : vector<8x256xf32>
    %53 = tpu.matmul %51, %52, %cst_18 {dimension_numbers = #tpu.dot_dimension_numbers<[1], [0], [0], [1], [0, 0, 1, 1], [], []>} : vector<8x128xbf16>, vector<128x256xbf16>, vector<8x256xf32> -> vector<8x256xf32>
    %54 = vector.extract_strided_slice %27 {offsets = [0, 128], sizes = [8, 128], strides = [1, 1]} : vector<8x256xf32> to vector<8x128xf32>
    %55 = vector.extract_strided_slice %53 {offsets = [0, 0], sizes = [8, 128], strides = [1, 1]} : vector<8x256xf32> to vector<8x128xf32>
    %56 = arith.addf %54, %55 : vector<8x128xf32>
    %cst_19 = arith.constant dense<0.000000e+00> : vector<128xf32>
    %57 = vector.multi_reduction <add>, %56, %cst_19 [0] : vector<8x128xf32> to vector<128xf32>
    %58 = vector.shape_cast %57 : vector<128xf32> to vector<1x128xf32>
    %cst_20 = arith.constant 8.000000e+00 : f32
    %59 = vector.broadcast %cst_20 : f32 to vector<1x128xf32>
    %60 = arith.divf %58, %59 : vector<1x128xf32>
    %61 = arith.mulf %56, %56 : vector<8x128xf32>
    %cst_21 = arith.constant dense<0.000000e+00> : vector<128xf32>
    %62 = vector.multi_reduction <add>, %61, %cst_21 [0] : vector<8x128xf32> to vector<128xf32>
    %63 = vector.shape_cast %62 : vector<128xf32> to vector<1x128xf32>
    %cst_22 = arith.constant 8.000000e+00 : f32
    %64 = vector.broadcast %cst_22 : f32 to vector<1x128xf32>
    %65 = arith.divf %63, %64 : vector<1x128xf32>
    %66 = arith.mulf %60, %60 : vector<1x128xf32>
    %67 = arith.subf %65, %66 : vector<1x128xf32>
    %68 = vector.broadcast %60 : vector<1x128xf32> to vector<8x128xf32>
    %69 = arith.subf %56, %68 : vector<8x128xf32>
    %cst_23 = arith.constant 9.99999974E-6 : f32
    %70 = vector.broadcast %cst_23 : f32 to vector<1x128xf32>
    %71 = arith.addf %67, %70 : vector<1x128xf32>
    %72 = math.rsqrt %71 : vector<1x128xf32>
    %73 = vector.broadcast %72 : vector<1x128xf32> to vector<8x128xf32>
    %74 = arith.mulf %69, %73 : vector<8x128xf32>
    %cst_24 = arith.constant 0.000000e+00 : f32
    %75 = vector.broadcast %cst_24 : f32 to vector<8x128xf32>
    %76 = arith.maximumf %74, %75 : vector<8x128xf32>
    %77 = arith.truncf %76 : vector<8x128xf32> to vector<8x128xbf16>
    %c0_25 = arith.constant 0 : index
    %c768 = arith.constant 768 : index
    %78 = vector.load %arg1[%c0_25, %c768] : memref<128x1408xbf16, #tpu.memory_space<vmem>>, vector<128x256xbf16>
    %cst_26 = arith.constant dense<0.000000e+00> : vector<8x256xf32>
    %79 = tpu.matmul %77, %78, %cst_26 {dimension_numbers = #tpu.dot_dimension_numbers<[1], [0], [0], [1], [0, 0, 1, 1], [], []>} : vector<8x128xbf16>, vector<128x256xbf16>, vector<8x256xf32> -> vector<8x256xf32>
    %80 = vector.extract_strided_slice %53 {offsets = [0, 128], sizes = [8, 128], strides = [1, 1]} : vector<8x256xf32> to vector<8x128xf32>
    %81 = vector.extract_strided_slice %79 {offsets = [0, 0], sizes = [8, 128], strides = [1, 1]} : vector<8x256xf32> to vector<8x128xf32>
    %82 = arith.addf %80, %81 : vector<8x128xf32>
    %cst_27 = arith.constant dense<0.000000e+00> : vector<128xf32>
    %83 = vector.multi_reduction <add>, %82, %cst_27 [0] : vector<8x128xf32> to vector<128xf32>
    %84 = vector.shape_cast %83 : vector<128xf32> to vector<1x128xf32>
    %cst_28 = arith.constant 8.000000e+00 : f32
    %85 = vector.broadcast %cst_28 : f32 to vector<1x128xf32>
    %86 = arith.divf %84, %85 : vector<1x128xf32>
    %87 = arith.mulf %82, %82 : vector<8x128xf32>
    %cst_29 = arith.constant dense<0.000000e+00> : vector<128xf32>
    %88 = vector.multi_reduction <add>, %87, %cst_29 [0] : vector<8x128xf32> to vector<128xf32>
    %89 = vector.shape_cast %88 : vector<128xf32> to vector<1x128xf32>
    %cst_30 = arith.constant 8.000000e+00 : f32
    %90 = vector.broadcast %cst_30 : f32 to vector<1x128xf32>
    %91 = arith.divf %89, %90 : vector<1x128xf32>
    %92 = arith.mulf %86, %86 : vector<1x128xf32>
    %93 = arith.subf %91, %92 : vector<1x128xf32>
    %94 = vector.broadcast %86 : vector<1x128xf32> to vector<8x128xf32>
    %95 = arith.subf %82, %94 : vector<8x128xf32>
    %cst_31 = arith.constant 9.99999974E-6 : f32
    %96 = vector.broadcast %cst_31 : f32 to vector<1x128xf32>
    %97 = arith.addf %93, %96 : vector<1x128xf32>
    %98 = math.rsqrt %97 : vector<1x128xf32>
    %99 = vector.broadcast %98 : vector<1x128xf32> to vector<8x128xf32>
    %100 = arith.mulf %95, %99 : vector<8x128xf32>
    %cst_32 = arith.constant 0.000000e+00 : f32
    %101 = vector.broadcast %cst_32 : f32 to vector<8x128xf32>
    %102 = arith.maximumf %100, %101 : vector<8x128xf32>
    %103 = arith.truncf %102 : vector<8x128xf32> to vector<8x128xbf16>
    %104 = vector.extract_strided_slice %79 {offsets = [0, 128], sizes = [8, 128], strides = [1, 1]} : vector<8x256xf32> to vector<8x128xf32>
    %c0_33 = arith.constant 0 : index
    %c1024 = arith.constant 1024 : index
    %105 = vector.load %arg1[%c0_33, %c1024] : memref<128x1408xbf16, #tpu.memory_space<vmem>>, vector<128x128xbf16>
    %cst_34 = arith.constant dense<0.000000e+00> : vector<8x128xf32>
    %106 = tpu.matmul %103, %105, %cst_34 {dimension_numbers = #tpu.dot_dimension_numbers<[1], [0], [0], [1], [0, 0, 1, 1], [], []>} : vector<8x128xbf16>, vector<128x128xbf16>, vector<8x128xf32> -> vector<8x128xf32>
    %107 = arith.addf %104, %106 : vector<8x128xf32>
    %cst_35 = arith.constant dense<0.000000e+00> : vector<128xf32>
    %108 = vector.multi_reduction <add>, %107, %cst_35 [0] : vector<8x128xf32> to vector<128xf32>
    %109 = vector.shape_cast %108 : vector<128xf32> to vector<1x128xf32>
    %cst_36 = arith.constant 8.000000e+00 : f32
    %110 = vector.broadcast %cst_36 : f32 to vector<1x128xf32>
    %111 = arith.divf %109, %110 : vector<1x128xf32>
    %112 = arith.mulf %107, %107 : vector<8x128xf32>
    %cst_37 = arith.constant dense<0.000000e+00> : vector<128xf32>
    %113 = vector.multi_reduction <add>, %112, %cst_37 [0] : vector<8x128xf32> to vector<128xf32>
    %114 = vector.shape_cast %113 : vector<128xf32> to vector<1x128xf32>
    %cst_38 = arith.constant 8.000000e+00 : f32
    %115 = vector.broadcast %cst_38 : f32 to vector<1x128xf32>
    %116 = arith.divf %114, %115 : vector<1x128xf32>
    %117 = arith.mulf %111, %111 : vector<1x128xf32>
    %118 = arith.subf %116, %117 : vector<1x128xf32>
    %119 = vector.broadcast %111 : vector<1x128xf32> to vector<8x128xf32>
    %120 = arith.subf %107, %119 : vector<8x128xf32>
    %cst_39 = arith.constant 9.99999974E-6 : f32
    %121 = vector.broadcast %cst_39 : f32 to vector<1x128xf32>
    %122 = arith.addf %118, %121 : vector<1x128xf32>
    %123 = math.rsqrt %122 : vector<1x128xf32>
    %124 = vector.broadcast %123 : vector<1x128xf32> to vector<8x128xf32>
    %125 = arith.mulf %120, %124 : vector<8x128xf32>
    %cst_40 = arith.constant 0.000000e+00 : f32
    %126 = vector.broadcast %cst_40 : f32 to vector<8x128xf32>
    %127 = arith.maximumf %125, %126 : vector<8x128xf32>
    %128 = arith.truncf %127 : vector<8x128xf32> to vector<8x128xbf16>
    %c0_41 = arith.constant 0 : index
    %c1152 = arith.constant 1152 : index
    %129 = vector.load %arg1[%c0_41, %c1152] : memref<128x1408xbf16, #tpu.memory_space<vmem>>, vector<128x128xbf16>
    %cst_42 = arith.constant dense<0.000000e+00> : vector<8x128xf32>
    %130 = tpu.matmul %128, %129, %cst_42 {dimension_numbers = #tpu.dot_dimension_numbers<[1], [0], [0], [1], [0, 0, 1, 1], [], []>} : vector<8x128xbf16>, vector<128x128xbf16>, vector<8x128xf32> -> vector<8x128xf32>
    %cst_43 = arith.constant dense<0.000000e+00> : vector<128xf32>
    %131 = vector.multi_reduction <add>, %130, %cst_43 [0] : vector<8x128xf32> to vector<128xf32>
    %132 = vector.shape_cast %131 : vector<128xf32> to vector<1x128xf32>
    %cst_44 = arith.constant 8.000000e+00 : f32
    %133 = vector.broadcast %cst_44 : f32 to vector<1x128xf32>
    %134 = arith.divf %132, %133 : vector<1x128xf32>
    %135 = arith.mulf %130, %130 : vector<8x128xf32>
    %cst_45 = arith.constant dense<0.000000e+00> : vector<128xf32>
    %136 = vector.multi_reduction <add>, %135, %cst_45 [0] : vector<8x128xf32> to vector<128xf32>
    %137 = vector.shape_cast %136 : vector<128xf32> to vector<1x128xf32>
    %cst_46 = arith.constant 8.000000e+00 : f32
    %138 = vector.broadcast %cst_46 : f32 to vector<1x128xf32>
    %139 = arith.divf %137, %138 : vector<1x128xf32>
    %140 = arith.mulf %134, %134 : vector<1x128xf32>
    %141 = arith.subf %139, %140 : vector<1x128xf32>
    %142 = vector.broadcast %134 : vector<1x128xf32> to vector<8x128xf32>
    %143 = arith.subf %130, %142 : vector<8x128xf32>
    %cst_47 = arith.constant 9.99999974E-6 : f32
    %144 = vector.broadcast %cst_47 : f32 to vector<1x128xf32>
    %145 = arith.addf %141, %144 : vector<1x128xf32>
    %146 = math.rsqrt %145 : vector<1x128xf32>
    %147 = vector.broadcast %146 : vector<1x128xf32> to vector<8x128xf32>
    %148 = arith.mulf %143, %147 : vector<8x128xf32>
    %cst_48 = arith.constant 0.000000e+00 : f32
    %149 = vector.broadcast %cst_48 : f32 to vector<8x128xf32>
    %150 = arith.maximumf %148, %149 : vector<8x128xf32>
    %151 = tpu.iota {dimensions = array<i32: 1>} : vector<8x128xi32>
    %c64_i32 = arith.constant 64 : i32
    %152 = vector.broadcast %c64_i32 : i32 to vector<8x128xi32>
    %153 = arith.cmpi eq, %151, %152 : vector<8x128xi32>
    %cst_49 = arith.constant 1.000000e+00 : f32
    %154 = vector.broadcast %cst_49 : f32 to vector<8x128xf32>
    %155 = arith.select %153, %154, %150 : vector<8x128xi1>, vector<8x128xf32>
    %156 = arith.truncf %155 : vector<8x128xf32> to vector<8x128xbf16>
    %c0_50 = arith.constant 0 : index
    %c1280 = arith.constant 1280 : index
    %157 = vector.load %arg1[%c0_50, %c1280] : memref<128x1408xbf16, #tpu.memory_space<vmem>>, vector<128x128xbf16>
    %cst_51 = arith.constant dense<0.000000e+00> : vector<8x128xf32>
    %158 = tpu.matmul %156, %157, %cst_51 {dimension_numbers = #tpu.dot_dimension_numbers<[1], [0], [0], [1], [0, 0, 1, 1], [], []>} : vector<8x128xbf16>, vector<128x128xbf16>, vector<8x128xf32> -> vector<8x128xf32>
    %c0_i32 = arith.constant 0 : i32
    %159 = vector.broadcast %c0_i32 : i32 to vector<8x128xi32>
    %160 = arith.cmpi sge, %151, %159 : vector<8x128xi32>
    %c4_i32 = arith.constant 4 : i32
    %161 = vector.broadcast %c4_i32 : i32 to vector<8x128xi32>
    %162 = arith.cmpi slt, %151, %161 : vector<8x128xi32>
    %163 = arith.andi %160, %162 : vector<8x128xi1>
    %cst_52 = arith.constant 0xFF800000 : f32
    %164 = vector.broadcast %cst_52 : f32 to vector<8x128xf32>
    %165 = arith.select %163, %158, %164 : vector<8x128xi1>, vector<8x128xf32>
    %cst_53 = arith.constant dense<0xFF800000> : vector<8xf32>
    %166 = vector.multi_reduction <maximumf>, %165, %cst_53 [1] : vector<8x128xf32> to vector<8xf32>
    %167 = vector.shape_cast %166 : vector<8xf32> to vector<8x1xf32>
    %168 = vector.shape_cast %167 : vector<8x1xf32> to vector<8x1xf32>
    %169 = vector.broadcast %168 : vector<8x1xf32> to vector<8x128xf32>
    %170 = arith.select %163, %158, %169 : vector<8x128xi1>, vector<8x128xf32>
    %171 = vector.broadcast %167 : vector<8x1xf32> to vector<8x128xf32>
    %172 = arith.subf %170, %171 : vector<8x128xf32>
    %173 = math.exp %172 : vector<8x128xf32>
    %cst_54 = arith.constant 0.000000e+00 : f32
    %174 = vector.broadcast %cst_54 : f32 to vector<8x128xf32>
    %175 = arith.select %163, %173, %174 : vector<8x128xi1>, vector<8x128xf32>
    %cst_55 = arith.constant dense<0.000000e+00> : vector<8xf32>
    %176 = vector.multi_reduction <add>, %175, %cst_55 [1] : vector<8x128xf32> to vector<8xf32>
    %177 = vector.shape_cast %176 : vector<8xf32> to vector<8x1xf32>
    %178 = tpu.reciprocal %177 {approx = true} : vector<8x1xf32> -> vector<8x1xf32>
    %179 = vector.broadcast %178 : vector<8x1xf32> to vector<8x128xf32>
    %180 = arith.mulf %175, %179 : vector<8x128xf32>
    %181 = arith.select %163, %180, %158 : vector<8x128xi1>, vector<8x128xf32>
    %c0_56 = arith.constant 0 : index
    %c0_57 = arith.constant 0 : index
    %182 = vector.load %arg2[%c0_56, %c0_57] : memref<8x128xf32, #tpu.memory_space<vmem>>, vector<8x128xf32>
    tpu.vector_store %arg2[%c0_56, %c0_57], %181 {strides = array<i32>} : memref<8x128xf32, #tpu.memory_space<vmem>>, vector<8x128xf32>,
    return
  }
}

</mosaic_0001>

<bundles_post_ra>
// kernel: pose_forward.1
= control target key start
LH: loop header
LB: loop body
LE: loop exit
PB: predicated region body
PF: predicated region fallthrough
CT: control target
= control target key end

     0   :  { %7 = vsyncpa [#allocation3], 0  ;;  %s1576_s0 = inlined_call_operand.hbm [shape: f32[8,128], index: 0, kind: input, shape index: {}]   ;;  %s1577_s1 = inlined_call_operand.hbm [shape: bf16[128,1408], index: 1, kind: input, shape index: {}]   ;;  %s1578_s2 = inlined_call_operand.hbm [shape: f32[8,128], index: 2, kind: output, shape index: {}]  }
   0x1   :  { %8 = vsyncpa [#allocation6], 0 }
   0x2   :  { %9 = vsyncpa [#allocation4], 0  ;;  %s1472_s9 = smov [#allocation2]   ;;  %s1473_s11 = smov [#allocation5]  }
   0x3   :  { %s16_s10 = sshll.u32 %s1472_s9, 4  ;;  %s25_s12 = sshll.u32 %s1473_s11, 4  ;;  %s17_s10 = int_to_ptr.vmem [resolvable:$true] %s16_s10  ;;  %s1495_s12 = int_to_ptr.vmem [resolvable:$true] %s25_s12 }
   0x4   :  { %s1400_s15 = scalar_lea.hbm %s1576_s0, 128 }
   0x5   :  { %p1401_p0 = scmp.ne.s32.totalorder %s1576_s0, %s1400_s15  ;;  %p1404_p1 = scmp.lt.u32.totalorder %s1400_s15, %s1576_s0 }
   0x7   :  { %p1406_p2 = pnand %p1404_p1, %p1401_p0 }
   0x9   :  { %1409 = shalt.err (!%p1406_p2)
}
   0xa   :  { %s1410_s20 = scalar_lea.vmem %s17_s10, 128  ;;  %p1415_p4 = scmp.lt.s32.totalorder %s17_s10, %s17_s10 }
   0xb   :  { %p1411_p3 = scmp.ne.s32.totalorder %s17_s10, %s1410_s20  ;;  %p1416_p5 = scmp.lt.s32.totalorder %s1410_s20, %s1410_s20 }
   0xd   :  { %p1417_p6 = por %p1416_p5, %p1415_p4 }
   0xf   :  { %p1418_p7 = pnand %p1417_p6, %p1411_p3 }
  0x11   :  { %1421 = shalt.err (!%p1418_p7)
}
  0x12   :  { %19 = dma.hbm_to_vmem [thread:$0]  %s1576_s0, 128, %s17_s10, [#allocation3]  }
  0x13   :  { %s1422_s25 = scalar_lea.hbm %s1577_s1, 11264 }
  0x14   :  { %p1423_p8 = scmp.ne.s32.totalorder %s1577_s1, %s1422_s25  ;;  %p1426_p9 = scmp.lt.u32.totalorder %s1422_s25, %s1577_s1 }
  0x16   :  { %p1428_p10 = pnand %p1426_p9, %p1423_p8 }
  0x18   :  { %1431 = shalt.err (!%p1428_p10)
}
  0x19   :  { %s1432_s30 = scalar_lea.vmem %s1495_s12, 11264  ;;  %p1437_p12 = scmp.lt.s32.totalorder %s1495_s12, %s1495_s12 }
  0x1a   :  { %p1433_p11 = scmp.ne.s32.totalorder %s1495_s12, %s1432_s30  ;;  %p1438_p13 = scmp.lt.s32.totalorder %s1432_s30, %s1432_s30 }
  0x1c   :  { %p1439_p0 = por %p1438_p13, %p1437_p12 }
  0x1e   :  { %p1440_p1 = pnand %p1439_p0, %p1433_p11 }
  0x20   :  { %1443 = shalt.err (!%p1440_p1)
}
  0x21   :  { %s1474_s0 = smov 704   ;;  %s1475_s3 = smov 44  }
  0x22   :  { %31 = dma.hbm_to_vmem [thread:$0]  %s1577_s1, 11264, %s1495_s12, [#allocation6], %s1474_s0, %s1474_s0, %s1475_s3  }
  0x23   :  { %1466 = dma.done.wait [#allocation3], 128  }
  0x24   :  { %1467 = vsyncadd [#allocation3], 4294967168 }
  0x25   :  { %1468 = dma.done.wait [#allocation6], 11264  }
  0x26   :  { %1469 = vsyncadd [#allocation6], 4294956032  ;;  %v1476_v0 = vmov 0   ;;  %v1264_v1 = vld [vmem:[#allocation5 + $0x4] ss:$44 sps:$4 sm:$0xff]   ;;  %v39_v17 = vld [vmem:[#allocation2] sm:$0xff] }
  0x27   :  { %169 = vmatprep.mubr.bf16.mxu0 %v1476_v0  ;;  %330 = vmatprep.mubr.bf16.mxu1 %v1476_v0  ;;  %v1266_v2 = vld [vmem:[#allocation5] ss:$44 sps:$4 sm:$0xff]   ;;  %v1267_v3 = vld [vmem:[#allocation5 + $0x5c] ss:$44 sps:$4 sm:$0xff]   ;;  %v1269_v4 = vld [vmem:[#allocation5 + $0x58] ss:$44 sps:$4 sm:$0xff]   ;;  %v40_v18 = vpack.c.bf16 %v39_v17, %v39_v17 }
  0x28   :  { %137 = vmatprep.subr.bf16.mxu0 %v1264_v1  ;;  %v1270_v5 = vld [vmem:[#allocation5 + $0xb4] ss:$44 sps:$4 sm:$0xff]   ;;  %v1272_v6 = vld [vmem:[#allocation5 + $0xb0] ss:$44 sps:$4 sm:$0xff]   ;;  %v1273_v7 = vld [vmem:[#allocation5 + $0x10c] ss:$44 sps:$4 sm:$0xff]  }
  0x29   :  { %138 = vmatpush1.bf16.msra.mxu0 %v1266_v2  ;;  %v1275_v8 = vld [vmem:[#allocation5 + $0x108] ss:$44 sps:$4 sm:$0xff]   ;;  %v1276_v9 = vld [vmem:[#allocation5 + $0x164] ss:$44 sps:$4 sm:$0xff]   ;;  %v1278_v10 = vld [vmem:[#allocation5 + $0x160] ss:$44 sps:$4 sm:$0xff]  }
  0x2a   :  { %139 = vmatprep.subr.bf16.mxu0 %v1267_v3  ;;  %v1279_v11 = vld [vmem:[#allocation5 + $0x1bc] ss:$44 sps:$4 sm:$0xff]   ;;  %v1281_v12 = vld [vmem:[#allocation5 + $0x1b8] ss:$44 sps:$4 sm:$0xff]   ;;  %v1282_v13 = vld [vmem:[#allocation5 + $0x214] ss:$44 sps:$4 sm:$0xff]  }
  0x2b   :  { %v1284_v14 = vld [vmem:[#allocation5 + $0x210] ss:$44 sps:$4 sm:$0xff]   ;;  %v1285_v15 = vld [vmem:[#allocation5 + $0x26c] ss:$44 sps:$4 sm:$0xff]   ;;  %v1287_v16 = vld [vmem:[#allocation5 + $0x268] ss:$44 sps:$4 sm:$0xff]  }
  0x2c   :  { %v1288_v19 = vld [vmem:[#allocation5 + $0xc] ss:$44 sps:$4 sm:$0xff]   ;;  %v1290_v20 = vld [vmem:[#allocation5 + $0x8] ss:$44 sps:$4 sm:$0xff]   ;;  %v1291_v21 = vld [vmem:[#allocation5 + $0x64] ss:$44 sps:$4 sm:$0xff]  }
  0x2d   :  { %140 = vmatpush1.bf16.msra.mxu0 %v1269_v4  ;;  %298 = vmatprep.subr.bf16.mxu1 %v1288_v19  ;;  %v1293_v22 = vld [vmem:[#allocation5 + $0x60] ss:$44 sps:$4 sm:$0xff]   ;;  %v1294_v23 = vld [vmem:[#allocation5 + $0xbc] ss:$44 sps:$4 sm:$0xff]   ;;  %v1296_v24 = vld [vmem:[#allocation5 + $0xb8] ss:$44 sps:$4 sm:$0xff]  }
  0x2e   :  { %141 = vmatprep.subr.bf16.mxu0 %v1270_v5  ;;  %299 = vmatpush1.bf16.msra.mxu1 %v1290_v20  ;;  %v1297_v25 = vld [vmem:[#allocation5 + $0x114] ss:$44 sps:$4 sm:$0xff]   ;;  %v1299_v26 = vld [vmem:[#allocation5 + $0x110] ss:$44 sps:$4 sm:$0xff]   ;;  %v1300_v27 = vld [vmem:[#allocation5 + $0x16c] ss:$44 sps:$4 sm:$0xff]  }
  0x2f   :  { %300 = vmatprep.subr.bf16.mxu1 %v1291_v21  ;;  %v1302_v28 = vld [vmem:[#allocation5 + $0x168] ss:$44 sps:$4 sm:$0xff]   ;;  %v1303_v29 = vld [vmem:[#allocation5 + $0x1c4] ss:$44 sps:$4 sm:$0xff]   ;;  %v1305_v30 = vld [vmem:[#allocation5 + $0x1c0] ss:$44 sps:$4 sm:$0xff]  }
  0x30   :  { %v1306_v31 = vld [vmem:[#allocation5 + $0x21c] ss:$44 sps:$4 sm:$0xff]   ;;  %v1308_v32 = vld [vmem:[#allocation5 + $0x218] ss:$44 sps:$4 sm:$0xff]   ;;  %v1309_v33 = vld [vmem:[#allocation5 + $0x274] ss:$44 sps:$4 sm:$0xff]  }
  0x31   :  { %142 = vmatpush1.bf16.msra.mxu0 %v1272_v6  ;;  %v1311_v34 = vld [vmem:[#allocation5 + $0x270] ss:$44 sps:$4 sm:$0xff]   ;;  %v1314_v62 = vld [vmem:[#allocation5 + $0x14] ss:$44 sps:$4 sm:$0xff]   ;;  %v1317_v1 = vld [vmem:[#allocation5 + $0x6c] ss:$44 sps:$4 sm:$0xff]  }
  0x32   :  { %143 = vmatprep.subr.bf16.mxu0 %v1273_v7  ;;  %301 = vmatpush1.bf16.msra.mxu1 %v1293_v22  ;;  %v1312_v63 = vld [vmem:[#allocation5 + $0x10] ss:$44 sps:$4 sm:$0xff]   ;;  %v1315_v2 = vld [vmem:[#allocation5 + $0x68] ss:$44 sps:$4 sm:$0xff]   ;;  %v1318_v4 = vld [vmem:[#allocation5 + $0xc0] ss:$44 sps:$4 sm:$0xff]  }
  0x33   :  { %302 = vmatprep.subr.bf16.mxu1 %v1294_v23  ;;  %v1320_v3 = vld [vmem:[#allocation5 + $0xc4] ss:$44 sps:$4 sm:$0xff]   ;;  %v1323_v5 = vld [vmem:[#allocation5 + $0x11c] ss:$44 sps:$4 sm:$0xff]   ;;  %v1326_v7 = vld [vmem:[#allocation5 + $0x174] ss:$44 sps:$4 sm:$0xff]  }
  0x34   :  { %v1321_v6 = vld [vmem:[#allocation5 + $0x118] ss:$44 sps:$4 sm:$0xff]   ;;  %vm1478_vm0 = vmmov 0   ;;  %s1479_s1 = smov [#allocation7]  }
  0x35   :  { %144 = vmatpush1.bf16.msra.mxu0 %v1275_v8  ;;  %v1324_v8 = vld [vmem:[#allocation5 + $0x170] ss:$44 sps:$4 sm:$0xff]   ;;  %s1071_s6 = sshll.u32 %s1479_s1, 4  ;;  %s1072_s6 = int_to_ptr.vmem [resolvable:$true] %s1071_s6 }
  0x36   :  { %145 = vmatprep.subr.bf16.mxu0 %v1276_v9  ;;  %303 = vmatpush1.bf16.msra.mxu1 %v1296_v24  ;;  %v1329_v9 = vld [vmem:[#allocation5 + $0x1cc] ss:$44 sps:$4 sm:$0xff]   ;;  %s1444_s7 = scalar_lea.vmem %s1072_s6, 128  ;;  %p1449_p3 = scmp.lt.s32.totalorder %s1072_s6, %s1072_s6 }
  0x37   :  { %304 = vmatprep.subr.bf16.mxu1 %v1297_v25  ;;  %p1445_p2 = scmp.ne.s32.totalorder %s1072_s6, %s1444_s7  ;;  %p1450_p4 = scmp.lt.s32.totalorder %s1444_s7, %s1444_s7 }
  0x39   :  { %146 = vmatpush1.bf16.msra.mxu0 %v1278_v10  ;;  %v1332_v10 = vld [vmem:[#allocation5 + $0x224] ss:$44 sps:$4 sm:$0xff]   ;;  %p1451_p5 = por %p1450_p4, %p1449_p3 }
  0x3a   :  { %147 = vmatprep.subr.bf16.mxu0 %v1279_v11  ;;  %305 = vmatpush1.bf16.msra.mxu1 %v1299_v26  ;;  %v1330_v11 = vld [vmem:[#allocation5 + $0x220] ss:$44 sps:$4 sm:$0xff]  }
  0x3b   :  { %306 = vmatprep.subr.bf16.mxu1 %v1300_v27  ;;  %p1452_p6 = pnand %p1451_p5, %p1445_p2 }
  0x3d   :  { %148 = vmatpush1.bf16.msra.mxu0 %v1281_v12  ;;  %v1335_v12 = vld [vmem:[#allocation5 + $0x27c] ss:$44 sps:$4 sm:$0xff]  }
  0x3e   :  { %149 = vmatprep.subr.bf16.mxu0 %v1282_v13  ;;  %307 = vmatpush1.bf16.msra.mxu1 %v1302_v28  ;;  %v1333_v13 = vld [vmem:[#allocation5 + $0x278] ss:$44 sps:$4 sm:$0xff]  }
  0x3f   :  { %308 = vmatprep.subr.bf16.mxu1 %v1303_v29 }
  0x41   :  { %150 = vmatpush1.bf16.msra.mxu0 %v1284_v14 }
  0x42   :  { %151 = vmatprep.subr.bf16.mxu0 %v1285_v15  ;;  %309 = vmatpush1.bf16.msra.mxu1 %v1305_v30 }
  0x43   :  { %310 = vmatprep.subr.bf16.mxu1 %v1306_v31 }
  0x45   :  { %152 = vmatpush1.bf16.msra.mxu0 %v1287_v16 }
  0x46   :  { %311 = vmatpush1.bf16.msra.mxu1 %v1308_v32  ;;  %459 = vmatprep.subr.bf16.mxu0 %v1314_v62 }
  0x47   :  { %312 = vmatprep.subr.bf16.mxu1 %v1309_v33 }
  0x48   :  { %170 = vmatmul.mubr.bf16.vlgmr.msra.gmra.mrb[0].mxu0 %v40_v18 }
  0x49   :  { %491 = vmatprep.mubr.bf16.mxu0 %v1476_v0  ;;  %460 = vmatpush1.bf16.msra.mxu0 %v1312_v63 }
  0x4a   :  { %313 = vmatpush1.bf16.msra.mxu1 %v1311_v34  ;;  %461 = vmatprep.subr.bf16.mxu0 %v1317_v1 }
  0x4d   :  { %462 = vmatpush1.bf16.msra.mxu0 %v1315_v2 }
  0x4e   :  { %463 = vmatprep.subr.bf16.mxu0 %v1320_v3 }
  0x51   :  { %464 = vmatpush1.bf16.msra.mxu0 %v1318_v4 }
  0x52   :  { %465 = vmatprep.subr.bf16.mxu0 %v1323_v5 }
  0x55   :  { %466 = vmatpush1.bf16.msra.mxu0 %v1321_v6 }
  0x56   :  { %467 = vmatprep.subr.bf16.mxu0 %v1326_v7 }
  0x59   :  { %468 = vmatpush1.bf16.msra.mxu0 %v1324_v8 }
  0x5a   :  { %469 = vmatprep.subr.bf16.mxu0 %v1329_v9 }
 0x11b   :  { %v171_v35 = vpop.f32.mrb[0].mxu0 }
 0x11c   :  { %v178_v36 = vrot.slane %v171_v35, 4  ;;  %v186_v37 = vmul.f32 %v171_v35, %v171_v35  ;;  %v173_v38 = vpop.f32.mrb[1].mxu0 }
 0x11d   :  { %v175_v39 = vpop.f32.mrb[2].mxu0 }
 0x11e   :  { %v179_v40 = vadd.f32 %v178_v36, %v171_v35  ;;  %v187_v41 = vrot.slane %v186_v37, 4  ;;  %v176_v42 = vpop.f32.mrb[3].mxu0 }
 0x11f   :  { %v1338_v42 = vld [vmem:[#allocation5 + $0x1c] ss:$44 sps:$4 sm:$0xff]  }
 0x120   :  { %v180_v43 = vrot.slane %v179_v40, 2  ;;  %v188_v44 = vadd.f32 %v187_v41, %v186_v37  ;;  %620 = vmatprep.subr.bf16.mxu1 %v1338_v42 }
 0x122   :  { %v181_v45 = vadd.f32 %v180_v43, %v179_v40  ;;  %v189_v46 = vrot.slane %v188_v44, 2  ;;  %v1336_v43 = vld [vmem:[#allocation5 + $0x18] ss:$44 sps:$4 sm:$0xff]  }
 0x124   :  { %v182_v47 = vrot.slane %v181_v45, 1  ;;  %v190_v48 = vadd.f32 %v189_v46, %v188_v44  ;;  %v1341_v44 = vld [vmem:[#allocation5 + $0x74] ss:$44 sps:$4 sm:$0xff]   ;;  %v1344_v46 = vld [vmem:[#allocation5 + $0xcc] ss:$44 sps:$4 sm:$0xff]  }
 0x126   :  { %v183_v49 = vadd.f32 %v182_v47, %v181_v45  ;;  %v191_v50 = vrot.slane %v190_v48, 1  ;;  %v1339_v45 = vld [vmem:[#allocation5 + $0x70] ss:$44 sps:$4 sm:$0xff]   ;;  %v1342_v47 = vld [vmem:[#allocation5 + $0xc8] ss:$44 sps:$4 sm:$0xff]  }
 0x128   :  { %v185_v51 = vmul.f32 0.125, %v183_v49  ;;  %v192_v52 = vadd.f32 %v191_v50, %v190_v48  ;;  %v1347_v48 = vld [vmem:[#allocation5 + $0x124] ss:$44 sps:$4 sm:$0xff]   ;;  %v1345_v49 = vld [vmem:[#allocation5 + $0x120] ss:$44 sps:$4 sm:$0xff]  }
 0x129   :  { %v1350_v50 = vld [vmem:[#allocation5 + $0x17c] ss:$44 sps:$4 sm:$0xff]  }
 0x12a   :  { %v193_v53 = vmul.f32 0.125, %v192_v52  ;;  %v194_v54 = vmul.f32 %v185_v51, %v185_v51  ;;  %v196_v57 = vsub.f32 %v171_v35, %v185_v51  ;;  %v1348_v51 = vld [vmem:[#allocation5 + $0x178] ss:$44 sps:$4 sm:$0xff]   ;;  %v1353_v52 = vld [vmem:[#allocation5 + $0x1d4] ss:$44 sps:$4 sm:$0xff]  }
 0x12c   :  { %v195_v55 = vsub.f32 %v193_v53, %v194_v54  ;;  %v1351_v53 = vld [vmem:[#allocation5 + $0x1d0] ss:$44 sps:$4 sm:$0xff]   ;;  %v1356_v54 = vld [vmem:[#allocation5 + $0x22c] ss:$44 sps:$4 sm:$0xff]  }
 0x12e   :  { %v197_v56 = vadd.f32 1e-05, %v195_v55  ;;  %v1354_v55 = vld [vmem:[#allocation5 + $0x228] ss:$44 sps:$4 sm:$0xff]  }
 0x130   :  { %1384 = vrsqrt.f32 %v197_v56  ;;  %v1359_v56 = vld [vmem:[#allocation5 + $0x284] ss:$44 sps:$4 sm:$0xff]  }
 0x13a   :  { %v1385_v58 = vpop.eup %1384 }
 0x13b   :  { %v199_v59 = vmul.f32 %v1385_v58, %v196_v57  ;;  %v1357_v57 = vld [vmem:[#allocation5 + $0x280] ss:$44 sps:$4 sm:$0xff]  }
 0x13d   :  { %v200_v60 = vmax.f32 %v199_v59, 0.0 }
 0x13f   :  { %v201_v61 = vpack.c.bf16 %v200_v60, %v200_v60 }
 0x141   :  { %331 = vmatmul.mubr.bf16.vlgmr.msra.gmra.mrb[0].mxu1 %v201_v61 }
 0x142   :  { %652 = vmatprep.mubr.bf16.mxu1 %v1476_v0  ;;  %v1327_v0 = vld [vmem:[#allocation5 + $0x1c8] ss:$44 sps:$4 sm:$0xff]   ;;  %621 = vmatpush1.bf16.msra.mxu1 %v1336_v43 }
 0x143   :  { %470 = vmatpush1.bf16.msra.mxu0 %v1327_v0  ;;  %622 = vmatprep.subr.bf16.mxu1 %v1341_v44 }
 0x144   :  { %471 = vmatprep.subr.bf16.mxu0 %v1332_v10 }
 0x146   :  { %623 = vmatpush1.bf16.msra.mxu1 %v1339_v45 }
 0x147   :  { %472 = vmatpush1.bf16.msra.mxu0 %v1330_v11  ;;  %624 = vmatprep.subr.bf16.mxu1 %v1344_v46 }
 0x148   :  { %473 = vmatprep.subr.bf16.mxu0 %v1335_v12 }
 0x14a   :  { %625 = vmatpush1.bf16.msra.mxu1 %v1342_v47 }
 0x14b   :  { %474 = vmatpush1.bf16.msra.mxu0 %v1333_v13  ;;  %626 = vmatprep.subr.bf16.mxu1 %v1347_v48 }
 0x14e   :  { %627 = vmatpush1.bf16.msra.mxu1 %v1345_v49 }
 0x14f   :  { %628 = vmatprep.subr.bf16.mxu1 %v1350_v50 }
 0x152   :  { %629 = vmatpush1.bf16.msra.mxu1 %v1348_v51 }
 0x153   :  { %630 = vmatprep.subr.bf16.mxu1 %v1353_v52 }
 0x156   :  { %631 = vmatpush1.bf16.msra.mxu1 %v1351_v53 }
 0x157   :  { %632 = vmatprep.subr.bf16.mxu1 %v1356_v54 }
 0x15a   :  { %633 = vmatpush1.bf16.msra.mxu1 %v1354_v55 }
 0x15b   :  { %634 = vmatprep.subr.bf16.mxu1 %v1359_v56 }
 0x15e   :  { %635 = vmatpush1.bf16.msra.mxu1 %v1357_v57 }
 0x214   :  { %v332_v14 = vpop.f32.mrb[0].mxu1 }
 0x215   :  { %v339_v15 = vadd.f32 %v332_v14, %v173_v38  ;;  %v334_v16 = vpop.f32.mrb[1].mxu1 }
 0x216   :  { %v336_v17 = vpop.f32.mrb[2].mxu1 }
 0x217   :  { %v340_v18 = vrot.slane %v339_v15, 4  ;;  %v347_v19 = vmul.f32 %v339_v15, %v339_v15  ;;  %v337_v20 = vpop.f32.mrb[3].mxu1 }
 0x219   :  { %v341_v21 = vadd.f32 %v340_v18, %v339_v15  ;;  %v348_v22 = vrot.slane %v347_v19, 4 }
 0x21b   :  { %v342_v23 = vrot.slane %v341_v21, 2  ;;  %v349_v24 = vadd.f32 %v348_v22, %v347_v19  ;;  %v1360_v22 = vld [vmem:[#allocation5 + $0x20] ss:$44 sps:$4 sm:$0xff]  }
 0x21d   :  { %v343_v25 = vadd.f32 %v342_v23, %v341_v21  ;;  %v350_v26 = vrot.slane %v349_v24, 2  ;;  %v1477_v23 = vmov 0.0  }
 0x21e   :  { %1196 = vmatprep.subr.bf16.mxu0 %v1477_v23  ;;  %1216 = vmatprep.subr.bf16.mxu1 %v1477_v23 }
 0x21f   :  { %v344_v27 = vrot.slane %v343_v25, 1  ;;  %v351_v28 = vadd.f32 %v350_v26, %v349_v24  ;;  %v1361_v24 = vld [vmem:[#allocation5 + $0x78] ss:$44 sps:$4 sm:$0xff]   ;;  %v1363_v26 = vld [vmem:[#allocation5 + $0x128] ss:$44 sps:$4 sm:$0xff]  }
 0x221   :  { %v345_v29 = vadd.f32 %v344_v27, %v343_v25  ;;  %v352_v30 = vrot.slane %v351_v28, 1  ;;  %v1362_v25 = vld [vmem:[#allocation5 + $0xd0] ss:$44 sps:$4 sm:$0xff]   ;;  %v1364_v27 = vld [vmem:[#allocation5 + $0x180] ss:$44 sps:$4 sm:$0xff]  }
 0x223   :  { %v346_v31 = vmul.f32 0.125, %v345_v29  ;;  %v353_v32 = vadd.f32 %v352_v30, %v351_v28  ;;  %v1365_v28 = vld [vmem:[#allocation5 + $0x1d8] ss:$44 sps:$4 sm:$0xff]   ;;  %v1366_v29 = vld [vmem:[#allocation5 + $0x230] ss:$44 sps:$4 sm:$0xff]  }
 0x224   :  { %v1367_v30 = vld [vmem:[#allocation5 + $0x288] ss:$44 sps:$4 sm:$0xff]  }
 0x225   :  { %v354_v33 = vmul.f32 0.125, %v353_v32  ;;  %v355_v34 = vmul.f32 %v346_v31, %v346_v31  ;;  %v357_v37 = vsub.f32 %v339_v15, %v346_v31 }
 0x227   :  { %v356_v35 = vsub.f32 %v354_v33, %v355_v34 }
 0x229   :  { %v358_v36 = vadd.f32 1e-05, %v356_v35 }
 0x22b   :  { %1386 = vrsqrt.f32 %v358_v36 }
 0x235   :  { %v1387_v38 = vpop.eup %1386 }
 0x236   :  { %v360_v39 = vmul.f32 %v1387_v38, %v357_v37 }
 0x238   :  { %v361_v40 = vmax.f32 %v360_v39, 0.0 }
 0x23a   :  { %v362_v41 = vpack.c.bf16 %v361_v40, %v361_v40 }
 0x23c   :  { %492 = vmatmul.mubr.bf16.vlgmr.msra.gmra.mrb[4].mxu0 %v362_v41 }
 0x23d   :  { %1197 = vmatpush3.bf16.msra.mxu0 %v1360_v22  ;;  %1212 = vmatprep.mubr.msk.bf16.mxu0 %vm1478_vm0, %v1477_v23 }
 0x23e   :  { %1198 = vmatprep.subr.bf16.mxu0 %v1477_v23 }
 0x241   :  { %1199 = vmatpush3.bf16.msra.mxu0 %v1361_v24 }
 0x242   :  { %1200 = vmatprep.subr.bf16.mxu0 %v1477_v23 }
 0x245   :  { %1201 = vmatpush3.bf16.msra.mxu0 %v1362_v25 }
 0x246   :  { %1202 = vmatprep.subr.bf16.mxu0 %v1477_v23 }
 0x249   :  { %1203 = vmatpush3.bf16.msra.mxu0 %v1363_v26 }
 0x24a   :  { %1204 = vmatprep.subr.bf16.mxu0 %v1477_v23 }
 0x24d   :  { %1205 = vmatpush3.bf16.msra.mxu0 %v1364_v27 }
 0x24e   :  { %1206 = vmatprep.subr.bf16.mxu0 %v1477_v23 }
 0x251   :  { %1207 = vmatpush3.bf16.msra.mxu0 %v1365_v28 }
 0x252   :  { %1208 = vmatprep.subr.bf16.mxu0 %v1477_v23 }
 0x255   :  { %1209 = vmatpush3.bf16.msra.mxu0 %v1366_v29 }
 0x256   :  { %1210 = vmatprep.subr.bf16.mxu0 %v1477_v23 }
 0x259   :  { %1211 = vmatpush3.bf16.msra.mxu0 %v1367_v30 }
 0x25a   :  { %1236 = vmatprep.subr.bf16.mxu0 %v1477_v23 }
 0x30f   :  { %v493_v58 = vpop.f32.mrb[4].mxu0 }
 0x310   :  { %v500_v59 = vadd.f32 %v493_v58, %v334_v16  ;;  %v495_v60 = vpop.f32.mrb[5].mxu0 }
 0x311   :  { %v497_v61 = vpop.f32.mrb[6].mxu0 }
 0x312   :  { %v501_v62 = vrot.slane %v500_v59, 4  ;;  %v508_v63 = vmul.f32 %v500_v59, %v500_v59  ;;  %v498_v1 = vpop.f32.mrb[7].mxu0  ;;  %v1370_v61 = vld [vmem:[#allocation5 + $0xd4] ss:$44 sps:$4 sm:$0xff]  }
 0x313   :  { %v1373_v1 = vld [vmem:[#allocation5 + $0x1dc] ss:$44 sps:$4 sm:$0xff]  }
 0x314   :  { %v502_v2 = vadd.f32 %v501_v62, %v500_v59  ;;  %v509_v3 = vrot.slane %v508_v63, 4  ;;  %v1371_v62 = vld [vmem:[#allocation5 + $0x12c] ss:$44 sps:$4 sm:$0xff]  }
 0x316   :  { %v503_v4 = vrot.slane %v502_v2, 2  ;;  %v510_v5 = vadd.f32 %v509_v3, %v508_v63  ;;  %v1372_v63 = vld [vmem:[#allocation5 + $0x184] ss:$44 sps:$4 sm:$0xff]   ;;  %v1375_v3 = vld [vmem:[#allocation5 + $0x28c] ss:$44 sps:$4 sm:$0xff]  }
 0x318   :  { %v504_v6 = vadd.f32 %v503_v4, %v502_v2  ;;  %v511_v7 = vrot.slane %v510_v5, 2  ;;  %v1374_v2 = vld [vmem:[#allocation5 + $0x234] ss:$44 sps:$4 sm:$0xff]  }
 0x31a   :  { %v505_v8 = vrot.slane %v504_v6, 1  ;;  %v512_v9 = vadd.f32 %v511_v7, %v510_v5 }
 0x31c   :  { %v506_v0 = vadd.f32 %v505_v8, %v504_v6  ;;  %v513_v10 = vrot.slane %v512_v9, 1 }
 0x31e   :  { %v507_v11 = vmul.f32 0.125, %v506_v0  ;;  %v514_v12 = vadd.f32 %v513_v10, %v512_v9 }
 0x320   :  { %v515_v13 = vmul.f32 0.125, %v514_v12  ;;  %v516_v14 = vmul.f32 %v507_v11, %v507_v11  ;;  %v518_v17 = vsub.f32 %v500_v59, %v507_v11  ;;  %v1368_v59 = vld [vmem:[#allocation5 + $0x24] ss:$44 sps:$4 sm:$0xff]  }
 0x322   :  { %v517_v15 = vsub.f32 %v515_v13, %v516_v14 }
 0x324   :  { %v519_v16 = vadd.f32 1e-05, %v517_v15 }
 0x326   :  { %1388 = vrsqrt.f32 %v519_v16 }
 0x330   :  { %v1389_v18 = vpop.eup %1388 }
 0x331   :  { %v521_v19 = vmul.f32 %v1389_v18, %v518_v17 }
 0x333   :  { %v522_v20 = vmax.f32 %v521_v19, 0.0 }
 0x335   :  { %v523_v21 = vpack.c.bf16 %v522_v20, %v522_v20 }
 0x337   :  { %653 = vmatmul.mubr.bf16.vlgmr.msra.gmra.mrb[4].mxu1 %v523_v21 }
 0x338   :  { %1232 = vmatprep.mubr.msk.bf16.mxu1 %vm1478_vm0, %v1477_v23  ;;  %1217 = vmatpush3.bf16.msra.mxu1 %v1368_v59 }
 0x339   :  { %1218 = vmatprep.subr.bf16.mxu1 %v1477_v23 }
 0x40a   :  { %v654_v31 = vpop.f32.mrb[4].mxu1 }
 0x40b   :  { %v661_v32 = vadd.f32 %v654_v31, %v495_v60  ;;  %v656_v33 = vpop.f32.mrb[5].mxu1  ;;  %v1369_v60 = vld [vmem:[#allocation5 + $0x7c] ss:$44 sps:$4 sm:$0xff]  }
 0x40c   :  { %v658_v34 = vpop.f32.mrb[6].mxu1  ;;  %1219 = vmatpush3.bf16.msra.mxu1 %v1369_v60 }
 0x40d   :  { %v662_v35 = vrot.slane %v661_v32, 4  ;;  %v669_v36 = vmul.f32 %v661_v32, %v661_v32  ;;  %v659_v37 = vpop.f32.mrb[7].mxu1  ;;  %1220 = vmatprep.subr.bf16.mxu1 %v1477_v23  ;;  %v1378_v34 = vld [vmem:[#allocation5 + $0xd8] ss:$44 sps:$4 sm:$0xff]  }
 0x40e   :  { %v1381_v37 = vld [vmem:[#allocation5 + $0x1e0] ss:$44 sps:$4 sm:$0xff]  }
 0x40f   :  { %v663_v38 = vadd.f32 %v662_v35, %v661_v32  ;;  %v670_v39 = vrot.slane %v669_v36, 4  ;;  %v1379_v35 = vld [vmem:[#allocation5 + $0x130] ss:$44 sps:$4 sm:$0xff]  }
 0x410   :  { %1221 = vmatpush3.bf16.msra.mxu1 %v1370_v61  ;;  %v939_v61 = vlaneseq }
 0x411   :  { %v664_v40 = vrot.slane %v663_v38, 2  ;;  %v671_v41 = vadd.f32 %v670_v39, %v669_v36  ;;  %1222 = vmatprep.subr.bf16.mxu1 %v1477_v23  ;;  %v1380_v36 = vld [vmem:[#allocation5 + $0x188] ss:$44 sps:$4 sm:$0xff]   ;;  %v1383_v39 = vld [vmem:[#allocation5 + $0x290] ss:$44 sps:$4 sm:$0xff]  }
 0x413   :  { %v665_v42 = vadd.f32 %v664_v40, %v663_v38  ;;  %v672_v43 = vrot.slane %v671_v41, 2  ;;  %v1382_v38 = vld [vmem:[#allocation5 + $0x238] ss:$44 sps:$4 sm:$0xff]  }
 0x414   :  { %1223 = vmatpush3.bf16.msra.mxu1 %v1371_v62  ;;  %v940_v62 = vand.u32 127, %v939_v61 }
 0x415   :  { %v666_v44 = vrot.slane %v665_v42, 1  ;;  %v673_v45 = vadd.f32 %v672_v43, %v671_v41  ;;  %1224 = vmatprep.subr.bf16.mxu1 %v1477_v23 }
 0x416   :  { %vm941_vm1 = vcmp.eq.s32.totalorder %v940_v62, 64  ;;  %vm1049_vm2 = vcmp.lt.s32.totalorder %v940_v62, 4 }
 0x417   :  { %v667_v46 = vadd.f32 %v666_v44, %v665_v42  ;;  %v674_v47 = vrot.slane %v673_v45, 1 }
 0x418   :  { %1225 = vmatpush3.bf16.msra.mxu1 %v1372_v63 }
 0x419   :  { %v668_v48 = vmul.f32 0.125, %v667_v46  ;;  %v675_v49 = vadd.f32 %v674_v47, %v673_v45  ;;  %1226 = vmatprep.subr.bf16.mxu1 %v1477_v23 }
 0x41b   :  { %v676_v50 = vmul.f32 0.125, %v675_v49  ;;  %v677_v51 = vmul.f32 %v668_v48, %v668_v48  ;;  %v679_v54 = vsub.f32 %v661_v32, %v668_v48  ;;  %v1376_v32 = vld [vmem:[#allocation5 + $0x28] ss:$44 sps:$4 sm:$0xff]  }
 0x41c   :  { %1227 = vmatpush3.bf16.msra.mxu1 %v1373_v1 }
 0x41d   :  { %v678_v52 = vsub.f32 %v676_v50, %v677_v51  ;;  %1228 = vmatprep.subr.bf16.mxu1 %v1477_v23 }
 0x41f   :  { %v680_v53 = vadd.f32 1e-05, %v678_v52 }
 0x420   :  { %1229 = vmatpush3.bf16.msra.mxu1 %v1374_v2 }
 0x421   :  { %1390 = vrsqrt.f32 %v680_v53  ;;  %1230 = vmatprep.subr.bf16.mxu1 %v1477_v23 }
 0x424   :  { %1231 = vmatpush3.bf16.msra.mxu1 %v1375_v3 }
 0x42b   :  { %v1391_v55 = vpop.eup %1390 }
 0x42c   :  { %v682_v56 = vmul.f32 %v1391_v55, %v679_v54 }
 0x42e   :  { %v683_v57 = vmax.f32 %v682_v56, 0.0 }
 0x430   :  { %v684_v58 = vpack.c.bf16 %v683_v57, %v683_v57 }
 0x432   :  { %1213 = vmatmul.mubr.bf16.vlgmr.msra.gmra.mrb[8].mxu0 %v684_v58 }
 0x433   :  { %1252 = vmatprep.mubr.msk.bf16.mxu0 %vm1478_vm0, %v1477_v23  ;;  %1237 = vmatpush3.bf16.msra.mxu0 %v1376_v32 }
 0x434   :  { %1238 = vmatprep.subr.bf16.mxu0 %v1477_v23 }
 0x505   :  { %v783_v4 = vpop.f32.mrb[8].mxu0 }
 0x506   :  { %v789_v5 = vadd.f32 %v783_v4, %v656_v33  ;;  %v1214_v6 = vpop.f32.mrb[9].mxu0  ;;  %v1377_v33 = vld [vmem:[#allocation5 + $0x80] ss:$44 sps:$4 sm:$0xff]  }
 0x507   :  { %v786_v7 = vpop.f32.mrb[10].mxu0  ;;  %1239 = vmatpush3.bf16.msra.mxu0 %v1377_v33 }
 0x508   :  { %v790_v8 = vrot.slane %v789_v5, 4  ;;  %v797_v9 = vmul.f32 %v789_v5, %v789_v5  ;;  %v1215_v0 = vpop.f32.mrb[11].mxu0  ;;  %1240 = vmatprep.subr.bf16.mxu0 %v1477_v23 }
 0x50a   :  { %v791_v10 = vadd.f32 %v790_v8, %v789_v5  ;;  %v798_v11 = vrot.slane %v797_v9, 4 }
 0x50b   :  { %1241 = vmatpush3.bf16.msra.mxu0 %v1378_v34 }
 0x50c   :  { %v792_v12 = vrot.slane %v791_v10, 2  ;;  %v799_v13 = vadd.f32 %v798_v11, %v797_v9  ;;  %1242 = vmatprep.subr.bf16.mxu0 %v1477_v23 }
 0x50e   :  { %v793_v14 = vadd.f32 %v792_v12, %v791_v10  ;;  %v800_v15 = vrot.slane %v799_v13, 2 }
 0x50f   :  { %1243 = vmatpush3.bf16.msra.mxu0 %v1379_v35 }
 0x510   :  { %v794_v16 = vrot.slane %v793_v14, 1  ;;  %v801_v17 = vadd.f32 %v800_v15, %v799_v13  ;;  %1244 = vmatprep.subr.bf16.mxu0 %v1477_v23 }
 0x512   :  { %v795_v18 = vadd.f32 %v794_v16, %v793_v14  ;;  %v802_v19 = vrot.slane %v801_v17, 1 }
 0x513   :  { %1245 = vmatpush3.bf16.msra.mxu0 %v1380_v36 }
 0x514   :  { %v796_v20 = vmul.f32 0.125, %v795_v18  ;;  %v803_v21 = vadd.f32 %v802_v19, %v801_v17  ;;  %1246 = vmatprep.subr.bf16.mxu0 %v1477_v23 }
 0x516   :  { %v804_v22 = vmul.f32 0.125, %v803_v21  ;;  %v805_v24 = vmul.f32 %v796_v20, %v796_v20  ;;  %v807_v27 = vsub.f32 %v789_v5, %v796_v20 }
 0x517   :  { %1247 = vmatpush3.bf16.msra.mxu0 %v1381_v37 }
 0x518   :  { %v806_v25 = vsub.f32 %v804_v22, %v805_v24  ;;  %1248 = vmatprep.subr.bf16.mxu0 %v1477_v23 }
 0x51a   :  { %v808_v26 = vadd.f32 1e-05, %v806_v25 }
 0x51b   :  { %1249 = vmatpush3.bf16.msra.mxu0 %v1382_v38 }
 0x51c   :  { %1392 = vrsqrt.f32 %v808_v26  ;;  %1250 = vmatprep.subr.bf16.mxu0 %v1477_v23 }
 0x51f   :  { %1251 = vmatpush3.bf16.msra.mxu0 %v1383_v39 }
 0x526   :  { %v1393_v28 = vpop.eup %1392 }
 0x527   :  { %v810_v29 = vmul.f32 %v1393_v28, %v807_v27 }
 0x529   :  { %v811_v30 = vmax.f32 %v810_v29, 0.0 }
 0x52b   :  { %v812_v31 = vpack.c.bf16 %v811_v30, %v811_v30 }
 0x52d   :  { %1233 = vmatmul.mubr.bf16.vlgmr.msra.gmra.mrb[8].mxu1 %v812_v31 }
 0x600   :  { %v911_v40 = vpop.f32.mrb[8].mxu1 }
 0x601   :  { %v917_v41 = vrot.slane %v911_v40, 4  ;;  %v924_v42 = vmul.f32 %v911_v40, %v911_v40  ;;  %v1234_v43 = vpop.f32.mrb[9].mxu1 }
 0x602   :  { %v914_v44 = vpop.f32.mrb[10].mxu1 }
 0x603   :  { %v918_v45 = vadd.f32 %v917_v41, %v911_v40  ;;  %v925_v46 = vrot.slane %v924_v42, 4  ;;  %v1235_v47 = vpop.f32.mrb[11].mxu1 }
 0x605   :  { %v919_v48 = vrot.slane %v918_v45, 2  ;;  %v926_v49 = vadd.f32 %v925_v46, %v924_v42 }
 0x607   :  { %v920_v50 = vadd.f32 %v919_v48, %v918_v45  ;;  %v927_v51 = vrot.slane %v926_v49, 2 }
 0x609   :  { %v921_v52 = vrot.slane %v920_v50, 1  ;;  %v928_v53 = vadd.f32 %v927_v51, %v926_v49 }
 0x60b   :  { %v922_v54 = vadd.f32 %v921_v52, %v920_v50  ;;  %v929_v55 = vrot.slane %v928_v53, 1 }
 0x60d   :  { %v923_v56 = vmul.f32 0.125, %v922_v54  ;;  %v930_v23 = vadd.f32 %v929_v55, %v928_v53 }
 0x60f   :  { %v931_v57 = vmul.f32 0.125, %v930_v23  ;;  %v932_v58 = vmul.f32 %v923_v56, %v923_v56  ;;  %v934_v63 = vsub.f32 %v911_v40, %v923_v56 }
 0x611   :  { %v933_v59 = vsub.f32 %v931_v57, %v932_v58 }
 0x613   :  { %v935_v60 = vadd.f32 1e-05, %v933_v59 }
 0x615   :  { %1394 = vrsqrt.f32 %v935_v60 }
 0x61f   :  { %v1395_v1 = vpop.eup %1394 }
 0x620   :  { %v937_v2 = vmul.f32 %v1395_v1, %v934_v63 }
 0x622   :  { %v938_v3 = vmax.f32 %v937_v2, 0.0 }
 0x624   :  { %v942_v4 = vsel %vm941_vm1, 1.0, %v938_v3 }
 0x625   :  { %v943_v5 = vpack.c.bf16 %v942_v4, %v942_v4 }
 0x627   :  { %1253 = vmatmul.mubr.bf16.vlgmr.msra.gmra.mrb[12].mxu0 %v943_v5 }
 0x6fa   :  { %v1042_v6 = vpop.f32.mrb[12].mxu0 }
 0x6fb   :  { %v1254_v7 = vpop.f32.mrb[13].mxu0  ;;  %v1051_v8 = vsel %vm1049_vm2, %v1042_v6, -inf }
 0x6fc   :  { %1052 = vmax.xlane.f32.xlu0 %v1051_v8  ;;  %v1045_v9 = vpop.f32.mrb[14].mxu0 }
 0x6fd   :  { %v1255_v0 = vpop.f32.mrb[15].mxu0 }
 0x789   :  { %v1053_v10 = vpop.xlane.xlu0 %1052 }
 0x78a   :  { %v1054_v11 = vsel %vm1049_vm2, %v1042_v6, %v1053_v10 }
 0x78b   :  { %v1055_v12 = vsub.f32 %v1054_v11, %v1053_v10 }
 0x78d   :  { %v1056_v13 = vmul.f32 1.442695, %v1055_v12 }
 0x78f   :  { %1396 = vpow2.f32 %v1056_v13 }
 0x799   :  { %v1397_v14 = vpop.eup %1396 }
 0x79a   :  { %v1058_v15 = vsel %vm1049_vm2, %v1397_v14, 0.0 }
 0x79b   :  { %1059 = vadd.xlane.f32.xlu0 %v1058_v15 }
 0x828   :  { %v1060_v16 = vpop.xlane.xlu0 %1059 }
 0x829   :  { %1398 = vrcp.f32 %v1060_v16 }
 0x833   :  { %v1399_v17 = vpop.eup %1398 }
 0x834   :  { %v1062_v18 = vmul.f32 %v1399_v17, %v1058_v15 }
 0x836   :  { %v1063_v19 = vsel %vm1049_vm2, %v1062_v18, %v1042_v6 }
 0x837   :  { %1064 = vst [vmem:[#allocation7] sm:$0xff] %v1063_v19 }
 0x838   :  { %1455 = shalt.err (!%p1452_p6)
}
 0x839   :  { %s1456_s10 = scalar_lea.hbm %s1578_s2, 128 }
 0x83a   :  { %p1457_p7 = scmp.ne.s32.totalorder %s1578_s2, %s1456_s10  ;;  %p1460_p8 = scmp.lt.u32.totalorder %s1456_s10, %s1578_s2 }
 0x83c   :  { %p1462_p9 = pnand %p1460_p8, %p1457_p7 }
 0x83e   :  { %1465 = shalt.err (!%p1462_p9)
}
 0x83f   :  { %1074 = dma.vmem_to_hbm [thread:$0]  %s1072_s6, 128, %s1578_s2, [#allocation4]  }
 0x840   :  { %1470 = dma.done.wait [#allocation4], 128  }
 0x841   :  { %1471 = vsyncadd [#allocation4], 4294967168 }
 0x842   :  { %1078 = vsyncpa [#allocation3], 1 }
 0x843   :  { %1079 = vsyncpa [#allocation6], 1 }
 0x844   :  { %1080 = vsyncpa [#allocation4], 1 }

</bundles_post_ra>
